<compile_context>
chip_gen: v6e
topology: v6e:2x2x1
jax: 0.10.0
libtpu: 0.0.40
codegen_flags: <defaults>
</compile_context>

<pallas_src>
import functools

import jax
import jax.numpy as jnp
from jax import lax
from jax.experimental import pallas as pl
from jax.experimental.pallas import tpu as pltpu


def _pick_tile(hw, cap):
    """Largest spatial tile <= cap that divides HW and is a multiple of 128."""
    for cand in (1024, 512, 256, 128):
        if cand <= cap and hw % cand == 0:
            return cand
    return hw  # full extent is always a legal block


# ---------------------------------------------------------------------------
# Pass 1: fused 1x1-conv projections (channels-first, bf16 MXU feed).
# ---------------------------------------------------------------------------
def _proj_kernel(x_ref, w_ref, b_ref, fb_ref, fc_ref, fd_ref, *, c8):
    x = x_ref[...].astype(jnp.bfloat16)                               # (C, tp)
    w = w_ref[...]                                                    # (C, Ctot) bf16
    # proj[o, n] = sum_c w[c, o] * x[c, n]   (TN contraction, MXU bf16 path)
    proj = lax.dot_general(w, x, (((0,), (0,)), ((), ())),
                           preferred_element_type=jnp.float32)        # (Ctot, tp) f32
    proj = proj + b_ref[...]                                          # f32 bias add
    fb_ref[...] = proj[:c8, :].astype(jnp.bfloat16)                   # (C8, tp)
    fc_ref[...] = proj[c8:2 * c8, :].astype(jnp.bfloat16)             # (C8, tp)
    fd_ref[...] = proj[2 * c8:, :].astype(jnp.bfloat16)               # (C,  tp)


# ---------------------------------------------------------------------------
# Pass 2: KV-chunked online-softmax position attention (channels-first).
# ---------------------------------------------------------------------------
def _attn_kernel(alpha_ref, x_ref, fb_ref, fc_ref, fd_ref, o_ref,
                 m_scr, l_scr, acc_scr):
    kv = pl.program_id(2)

    @pl.when(kv == 0)
    def _():
        m_scr[...] = jnp.full_like(m_scr, -jnp.inf)
        l_scr[...] = jnp.zeros_like(l_scr)
        acc_scr[...] = jnp.zeros_like(acc_scr)

    fb = fb_ref[...]                                                  # (C8, tq) bf16
    fc = fc_ref[...]                                                  # (C8, tk) bf16

    # energy[m, n] = <fc[:, m], fb[:, n]>  (kv-major so m/l/corr are (1, tq)
    # row vectors that broadcast naturally over the (C, tq) accumulator).
    energy = lax.dot_general(fc, fb, (((0,), (0,)), ((), ())),
                             preferred_element_type=jnp.float32)      # (tk, tq) f32

    m_prev = m_scr[...]                                               # (1, tq)
    m_new = jnp.maximum(m_prev, jnp.max(energy, axis=0, keepdims=True))
    corr = jnp.exp(m_prev - m_new)                                    # (1, tq)

    # p is materialized once, in bf16; l sums exactly what the MXU consumes.
    p = jnp.exp(energy - m_new).astype(jnp.bfloat16)                  # (tk, tq) bf16
    l_scr[...] = corr * l_scr[...] + jnp.sum(p.astype(jnp.float32),
                                             axis=0, keepdims=True)
    acc_scr[...] = corr * acc_scr[...] + jnp.dot(
        fd_ref[...], p, preferred_element_type=jnp.float32)           # (C, tq) f32
    m_scr[...] = m_new

    @pl.when(kv == pl.num_programs(2) - 1)
    def _():
        inv_l = pl.reciprocal(l_scr[...], approx=True)                # EUP slot
        o_ref[...] = alpha_ref[0] * (acc_scr[...] * inv_l) + x_ref[...]


def position_attention_pallas(x_nchw, wb, wc, wd, bb, bc, bd, alpha,
                              *, max_tp=512, max_tq=512, max_tk=512):
    """x_nchw: (B, C, H, W) f32.  Weights (Cin, Cout), biases (Cout,)."""
    B, C, H, W = x_nchw.shape
    HW = H * W
    C8 = wb.shape[1]
    Ctot = 2 * C8 + C

    # Free reshape: stays in the NCHW channels-first layout, no HBM transpose.
    x_flat = x_nchw.reshape(B, C, HW)

    w_all = jnp.concatenate([wb, wc, wd], axis=1).astype(jnp.bfloat16)  # (C, Ctot)
    b_all = jnp.concatenate([bb, bc, bd], axis=0).reshape(Ctot, 1)      # (Ctot, 1) f32

    tp = _pick_tile(HW, max_tp)
    tq = _pick_tile(HW, max_tq)
    tk = _pick_tile(HW, max_tk)

    vmem_limit = 32 * 1024 * 1024   # > v5e default, == v6e/v7x default, < v7x phys

    # ---- Pass 1: fused projections, bf16 outputs, lane-dense stores -------
    fb, fc, fd = pl.pallas_call(
        functools.partial(_proj_kernel, c8=C8),
        out_shape=(
            jax.ShapeDtypeStruct((B, C8, HW), jnp.bfloat16),
            jax.ShapeDtypeStruct((B, C8, HW), jnp.bfloat16),
            jax.ShapeDtypeStruct((B, C, HW), jnp.bfloat16),
        ),
        grid=(B, HW // tp),
        in_specs=[
            pl.BlockSpec((pl.Squeezed(), C, tp), lambda b, i: (b, 0, i)),   # x
            pl.BlockSpec((C, Ctot), lambda b, i: (0, 0)),                   # [Wb|Wc|Wd]
            pl.BlockSpec((Ctot, 1), lambda b, i: (0, 0)),                   # biases
        ],
        out_specs=(
            pl.BlockSpec((pl.Squeezed(), C8, tp), lambda b, i: (b, 0, i)),
            pl.BlockSpec((pl.Squeezed(), C8, tp), lambda b, i: (b, 0, i)),
            pl.BlockSpec((pl.Squeezed(), C, tp), lambda b, i: (b, 0, i)),
        ),
        compiler_params=pltpu.CompilerParams(
            dimension_semantics=("parallel", "parallel"),
            vmem_limit_bytes=vmem_limit),
    )(x_flat, w_all, b_all)

    # ---- Pass 2: KV-chunked online-softmax attention -----------------------
    alpha_arr = jnp.asarray(alpha, jnp.float32).reshape(1)            # SMEM scalar

    out_flat = pl.pallas_call(
        _attn_kernel,
        out_shape=jax.ShapeDtypeStruct((B, C, HW), jnp.float32),
        grid=(B, HW // tq, HW // tk),
        in_specs=[
            pl.BlockSpec(memory_space=pltpu.MemorySpace.SMEM),                   # alpha
            pl.BlockSpec((pl.Squeezed(), C, tq), lambda b, q, k: (b, 0, q)),     # x
            pl.BlockSpec((pl.Squeezed(), C8, tq), lambda b, q, k: (b, 0, q)),    # fb
            pl.BlockSpec((pl.Squeezed(), C8, tk), lambda b, q, k: (b, 0, k)),    # fc
            pl.BlockSpec((pl.Squeezed(), C, tk), lambda b, q, k: (b, 0, k)),     # fd
        ],
        out_specs=pl.BlockSpec((pl.Squeezed(), C, tq), lambda b, q, k: (b, 0, q)),
        scratch_shapes=[
            pltpu.VMEM((1, tq), jnp.float32),    # running max m
            pltpu.VMEM((1, tq), jnp.float32),    # running sum l
            pltpu.VMEM((C, tq), jnp.float32),    # output accumulator
        ],
        compiler_params=pltpu.CompilerParams(
            dimension_semantics=("parallel", "parallel", "arbitrary"),
            vmem_limit_bytes=vmem_limit),
    )(alpha_arr, x_flat, fb, fc, fd)

    return out_flat.reshape(B, C, H, W)   # free reshape back to NCHW


def position_attention_reference(x_nchw, wb, wc, wd, bb, bc, bd, alpha):
    """Plain-JAX f32 mirror of the PyTorch forward, for verification."""
    B, C, H, W = x_nchw.shape
    HW = H * W
    x_flat = x_nchw.reshape(B, C, HW)
    fbr = jnp.einsum('bcn,co->bon', x_flat, wb) + bb[None, :, None]   # (B, C8, HW)
    fcr = jnp.einsum('bcn,co->bon', x_flat, wc) + bc[None, :, None]   # (B, C8, HW)
    fdr = jnp.einsum('bcn,co->bon', x_flat, wd) + bd[None, :, None]   # (B, C, HW)
    energy = jnp.einsum('bcn,bcm->bnm', fbr, fcr)                     # (B, HW, HW)
    attn = jax.nn.softmax(energy, axis=-1)
    fer = jnp.einsum('bcm,bnm->bcn', fdr, attn).reshape(B, C, H, W)
    return alpha * fer + x_nchw


if __name__ == "__main__":
    B, C, H, W = 2, 32, 16, 16        # in_channels=32 -> C//8 = 4, HW = 256
    C8 = C // 8

    key = jax.random.PRNGKey(0)
    kx, kwb, kwc, kwd, kbb, kbc, kbd = jax.random.split(key, 7)

    x = jax.random.normal(kx, (B, C, H, W), dtype=jnp.float32)

    # Conv weights stored as (Cin, Cout) (== PyTorch (Cout, Cin, 1, 1) for 1x1).
    wb = jax.random.normal(kwb, (C, C8), dtype=jnp.float32) * 0.1
    wc = jax.random.normal(kwc, (C, C8), dtype=jnp.float32) * 0.1
    wd = jax.random.normal(kwd, (C, C), dtype=jnp.float32) * 0.1
    bb = jax.random.normal(kbb, (C8,), dtype=jnp.float32) * 0.1
    bc = jax.random.normal(kbc, (C8,), dtype=jnp.float32) * 0.1
    bd = jax.random.normal(kbd, (C,), dtype=jnp.float32) * 0.1
    # Module inits alpha to 0 (attention branch would be a no-op); use a
    # nonzero value so the kernel's hot path is exercised.
    alpha = jnp.float32(0.5)

    # Small tile caps so the self-test exercises the multi-tile projection
    # grid AND the multi-chunk online-softmax loop (2 query x 2 kv chunks).
    out = jax.block_until_ready(
        position_attention_pallas(x, wb, wc, wd, bb, bc, bd, alpha,
                                  max_tp=128, max_tq=128, max_tk=128))
    ref = position_attention_reference(x, wb, wc, wd, bb, bc, bd, alpha)

    assert out.shape == (B, C, H, W)
    # bf16 MXU operands (x, w, fb/fc/fd, p) + approx reciprocal of the softmax
    # denominator vs. exact f32 reference -> relaxed but still tight tolerance.
    assert jnp.allclose(out, ref, atol=2e-2, rtol=2e-2), "mismatch vs reference"

    print("KERNEL_OK")
</pallas_src>

<mosaic_0001>
module attributes {stable_mosaic.version = 11 : i64} {
  func.func @_proj_kernel(%arg0: i32, %arg1: i32, %arg2: memref<1x32x128xf32, #tpu.memory_space<vmem>>, %arg3: memref<32x40xbf16, #tpu.memory_space<vmem>>, %arg4: memref<40x1xf32, #tpu.memory_space<vmem>>, %arg5: memref<1x4x128xbf16, #tpu.memory_space<vmem>>, %arg6: memref<1x4x128xbf16, #tpu.memory_space<vmem>>, %arg7: memref<1x32x128xbf16, #tpu.memory_space<vmem>>) attributes {dimension_semantics = [#tpu.dimension_semantics<parallel>, #tpu.dimension_semantics<parallel>], iteration_bounds = array<i64: 2, 2>, scalar_prefetch = 0 : i64, scratch_operands = 0 : i64, tpu.core_type = #tpu.core_type<tc>, window_params = [{transform_indices = @transform_0, window_bounds = array<i64: 1, 32, 128>}, {pipeline_mode = #tpu.pipeline_mode<synchronous>, transform_indices = @transform_1, window_bounds = array<i64: 32, 40>}, {pipeline_mode = #tpu.pipeline_mode<synchronous>, transform_indices = @transform_2, window_bounds = array<i64: 40, 1>}, {transform_indices = @transform_3, window_bounds = array<i64: 1, 4, 128>}, {transform_indices = @transform_4, window_bounds = array<i64: 1, 4, 128>}, {transform_indices = @transform_5, window_bounds = array<i64: 1, 32, 128>}]} {
    %c0 = arith.constant 0 : index
    %c0_0 = arith.constant 0 : index
    %c0_1 = arith.constant 0 : index
    %0 = vector.load %arg2[%c0, %c0_0, %c0_1] : memref<1x32x128xf32, #tpu.memory_space<vmem>>, vector<1x32x128xf32>
    %1 = vector.shape_cast %0 : vector<1x32x128xf32> to vector<32x128xf32>
    %2 = arith.truncf %1 : vector<32x128xf32> to vector<32x128xbf16>
    %c0_2 = arith.constant 0 : index
    %c0_3 = arith.constant 0 : index
    %3 = vector.load %arg3[%c0_2, %c0_3] : memref<32x40xbf16, #tpu.memory_space<vmem>>, vector<32x40xbf16>
    %cst = arith.constant dense<0.000000e+00> : vector<40x128xf32>
    %4 = tpu.matmul %3, %2, %cst {dimension_numbers = #tpu.dot_dimension_numbers<[0], [0], [1], [1], [0, 1, 1, 1], [], []>} : vector<32x40xbf16>, vector<32x128xbf16>, vector<40x128xf32> -> vector<40x128xf32>
    %c0_4 = arith.constant 0 : index
    %c0_5 = arith.constant 0 : index
    %5 = vector.load %arg4[%c0_4, %c0_5] : memref<40x1xf32, #tpu.memory_space<vmem>>, vector<40x1xf32>
    %6 = vector.broadcast %5 : vector<40x1xf32> to vector<40x128xf32>
    %7 = arith.addf %4, %6 : vector<40x128xf32>
    %8 = vector.extract_strided_slice %7 {offsets = [0, 0], sizes = [4, 128], strides = [1, 1]} : vector<40x128xf32> to vector<4x128xf32>
    %9 = arith.truncf %8 : vector<4x128xf32> to vector<4x128xbf16>
    %c0_6 = arith.constant 0 : index
    %c0_7 = arith.constant 0 : index
    %c0_8 = arith.constant 0 : index
    %10 = vector.load %arg5[%c0_6, %c0_7, %c0_8] : memref<1x4x128xbf16, #tpu.memory_space<vmem>>, vector<1x4x128xbf16>
    %11 = vector.shape_cast %10 : vector<1x4x128xbf16> to vector<4x128xbf16>
    %12 = vector.shape_cast %9 : vector<4x128xbf16> to vector<1x4x128xbf16>
    tpu.vector_store %arg5[%c0_6, %c0_7, %c0_8], %12 {strides = array<i32>} : memref<1x4x128xbf16, #tpu.memory_space<vmem>>, vector<1x4x128xbf16>,
    %13 = vector.extract_strided_slice %7 {offsets = [4, 0], sizes = [4, 128], strides = [1, 1]} : vector<40x128xf32> to vector<4x128xf32>
    %14 = arith.truncf %13 : vector<4x128xf32> to vector<4x128xbf16>
    %c0_9 = arith.constant 0 : index
    %c0_10 = arith.constant 0 : index
    %c0_11 = arith.constant 0 : index
    %15 = vector.load %arg6[%c0_9, %c0_10, %c0_11] : memref<1x4x128xbf16, #tpu.memory_space<vmem>>, vector<1x4x128xbf16>
    %16 = vector.shape_cast %15 : vector<1x4x128xbf16> to vector<4x128xbf16>
    %17 = vector.shape_cast %14 : vector<4x128xbf16> to vector<1x4x128xbf16>
    tpu.vector_store %arg6[%c0_9, %c0_10, %c0_11], %17 {strides = array<i32>} : memref<1x4x128xbf16, #tpu.memory_space<vmem>>, vector<1x4x128xbf16>,
    %18 = vector.extract_strided_slice %7 {offsets = [8, 0], sizes = [32, 128], strides = [1, 1]} : vector<40x128xf32> to vector<32x128xf32>
    %19 = arith.truncf %18 : vector<32x128xf32> to vector<32x128xbf16>
    %c0_12 = arith.constant 0 : index
    %c0_13 = arith.constant 0 : index
    %c0_14 = arith.constant 0 : index
    %20 = vector.load %arg7[%c0_12, %c0_13, %c0_14] : memref<1x32x128xbf16, #tpu.memory_space<vmem>>, vector<1x32x128xbf16>
    %21 = vector.shape_cast %20 : vector<1x32x128xbf16> to vector<32x128xbf16>
    %22 = vector.shape_cast %19 : vector<32x128xbf16> to vector<1x32x128xbf16>
    tpu.vector_store %arg7[%c0_12, %c0_13, %c0_14], %22 {strides = array<i32>} : memref<1x32x128xbf16, #tpu.memory_space<vmem>>, vector<1x32x128xbf16>,
    return
  }
  func.func @transform_0(%arg0: i32, %arg1: i32) -> (i32, i32, i32) {
    %c0_i32 = arith.constant 0 : i32
    %c0_i32_0 = arith.constant 0 : i32
    return %arg0, %c0_i32, %arg1 : i32, i32, i32
  }
  func.func @transform_1(%arg0: i32, %arg1: i32) -> (i32, i32) {
    %c0_i32 = arith.constant 0 : i32
    %c0_i32_0 = arith.constant 0 : i32
    %c0_i32_1 = arith.constant 0 : i32
    return %c0_i32, %c0_i32_0 : i32, i32
  }
  func.func @transform_2(%arg0: i32, %arg1: i32) -> (i32, i32) {
    %c0_i32 = arith.constant 0 : i32
    %c0_i32_0 = arith.constant 0 : i32
    %c0_i32_1 = arith.constant 0 : i32
    return %c0_i32, %c0_i32_0 : i32, i32
  }
  func.func @transform_3(%arg0: i32, %arg1: i32) -> (i32, i32, i32) {
    %c0_i32 = arith.constant 0 : i32
    %c0_i32_0 = arith.constant 0 : i32
    return %arg0, %c0_i32, %arg1 : i32, i32, i32
  }
  func.func @transform_4(%arg0: i32, %arg1: i32) -> (i32, i32, i32) {
    %c0_i32 = arith.constant 0 : i32
    %c0_i32_0 = arith.constant 0 : i32
    return %arg0, %c0_i32, %arg1 : i32, i32, i32
  }
  func.func @transform_5(%arg0: i32, %arg1: i32) -> (i32, i32, i32) {
    %c0_i32 = arith.constant 0 : i32
    %c0_i32_0 = arith.constant 0 : i32
    return %arg0, %c0_i32, %arg1 : i32, i32, i32
  }
}

</mosaic_0001>

<bundles_post_ra>
// kernel: tpu_custom_call.1
= control target key start
LH: loop header
LB: loop body
LE: loop exit
PB: predicated region body
PF: predicated region fallthrough
CT: control target
= control target key end

     0   :  { %s1349_s0 = inlined_call_operand.hbm [shape: f32[2,32,256], index: 0, kind: input, shape index: {}]   ;;  %s1350_s1 = inlined_call_operand.vmem [shape: bf16[32,40], index: 1, kind: input, shape index: {}]   ;;  %s1351_s2 = inlined_call_operand.vmem [shape: f32[40,1], index: 2, kind: input, shape index: {}]   ;;  %s1352_s3 = inlined_call_operand.hbm [shape: bf16[2,4,256], index: 3, kind: output, shape index: {0}]   ;;  %s1353_s4 = inlined_call_operand.hbm [shape: bf16[2,4,256], index: 4, kind: output, shape index: {1}]   ;;  %s1354_s5 = inlined_call_operand.hbm [shape: bf16[2,32,256], index: 5, kind: output, shape index: {2}]  }
   0x1   :  { %1361 = sst [smem:[#allocation15_spill]] %s1353_s4 }
   0x2   :  { %1362 = sst [smem:[#allocation16_spill]] %s1354_s5 }
   0x3   :  { %11 = vsyncpa [#allocation3], 0 }
   0x4   :  { %13 = vsyncpa [#allocation3 + $0x1], 0 }
   0x5   :  { %14 = vsyncpa [#allocation4], 0 }
   0x6   :  { %16 = vsyncpa [#allocation4 + $0x1], 0 }
   0x7   :  { %17 = vsyncpa [#allocation7], 0 }
   0x8   :  { %19 = vsyncpa [#allocation7 + $0x1], 0  ;;  %s1058_s18 = smov 0   ;;  %s1060_s19 = smov 0  }
   0x9   :  { %s1062_s20 = smov 0   ;;  %s1064_s21 = smov 0  }
   0xa   :  { %s1066_s22 = smov 0   ;;  %s1068_s23 = smov 0  }
   0xb   :  { %s1070_s24 = smov 0   ;;  %s1072_s25 = smov 0  }
   0xc LB: > { %1363 = sst [smem:[#allocation12_spill]] %s984_s18  ;;  %s1099_s26 = sadd.s32 4294967295, %s1012_s25   ;;  %s1012_s25 = sphi %s1072_s25, %s25_s25   ;;  %s1008_s24 = sphi %s1070_s24, %s1388_s24   ;;  %s1004_s23 = sphi %s1068_s23, %s1387_s23   ;;  %s1000_s22 = sphi %s1066_s22, %s1386_s22   ;;  %s996_s21 = sphi %s1064_s21, %s1385_s21   ;;  %s992_s20 = sphi %s1062_s20, %s1384_s20   ;;  %s988_s19 = sphi %s1060_s19, %s1383_s19   ;;  %s984_s18 = sphi %s1058_s18, %s1382_s18  }
   0xd   : > { %s1360_s27 = sadd.s32 4294967294, %s1012_s25   ;;  %s34_s28 = sadd.s32 1, %s1004_s23 }
   0xe   : > { %s37_s29 = sadd.s32 1, %s1008_s24  ;;  %p35_p0 = scmp.ge.s32.totalorder %s34_s28, 2 }
   0xf   : > { %s46_s30 = sadd.s32 1, %s992_s20  ;;  %p53_p1 = scmp.ne.s32.totalorder %s992_s20, %s988_s19 }
  0x10   : > { %p54_p2 = scmp.eq.s32.totalorder %s1012_s25, 0  ;;  %s1390_s28 = smov (%p35_p0, %s34_s28), 0 }
  0x11   : > { %1364 = sst [smem:[#allocation13_spill]] %s1390_s28  ;;  %s1392_s29 = smov (!%p35_p0, %s37_s29), %s1008_s24 }
  0x12   : > { %s42_s6 = ssub.s32 %s1004_s23, %s1390_s28  ;;  %p1113_p3 = por %p54_p2, %p53_p1 }
  0x13   : > { %p39_p4 = scmp.ge.s32.totalorder %s1392_s29, 2  ;;  %p59_p5 = scmp.ne.s32.totalorder %s988_s19, %s984_s18 }
  0x14   : > { %p60_p6 = scmp.eq.s32.totalorder %s1099_s26, 0  ;;  %p127_p7 = scmp.eq.s32.totalorder %s1099_s26, 3 }
  0x15   : > { %s1394_s29 = smov (%p39_p4, %s1392_s29), 0  ;;  %p133_p10 = scmp.eq.s32.totalorder %s1360_s27, 3 }
  0x16   : > { %1366 = sst [smem:[#allocation14_spill]] %s1394_s29  ;;  %p1123_p8 = por %p60_p6, %p59_p5 }
  0x17   : > { %p1127_p9 = por %p127_p7, %p53_p1  ;;  %s41_s10 = ssub.s32 %s1008_s24, %s1394_s29 }
  0x18   : > { %s43_s11 = sor.u32 %s42_s6, %s41_s10  ;;  %p1135_p12 = por %p133_p10, %p59_p5 }
  0x19   : > { %p44_p11 = scmp.eq.s32.totalorder %s43_s11, 0  ;;  %p752_p13 = scmp.lt.s32.totalorder %s1012_s25, 4 }
  0x1a   : > { %s215_s13 = sand.u32 1, %s992_s20   ;;  %s663_s16 = sshll.u32 %s1008_s24, 3 }
  0x1b   : > { %s1142_s14 = scalar_select %p44_p11, %s992_s20, %s46_s30  }
  0x1c   : > { %s662_s15 = sshll.u32 %s215_s13, 5  ;;  %s224_s17 = sadd.s32 %s1004_s23, %s663_s16 }
  0x1d   : > { %s219_s28 = scalar_lea.vmem [#allocation2], %s662_s15  ;;  %s664_s5 = sshll.u32 %s224_s17, 7 }
  0x1e   : > { %s227_s18 = sshll.u32 %s219_s28, 4  ;;  %s226_s6 = scalar_lea.hbm %s1349_s0, %s664_s5  ;;  %s228_s18 = int_to_ptr.vmem [resolvable:$true] %s227_s18 }
  0x1f   : > { %p1151_p0 = pnand %p752_p13, %p1113_p3  ;;  %s216_s11 = scalar_lea.sflag [#allocation3], %s215_s13 }
  0x20   : > { %s845_s30 = scalar_lea.vmem %s228_s18, 512  ;;  %s1014_s28 = smov [#allocation2]  }
  0x21   : > { %p834_p1 = pneg %p1151_p0  ;;  %p846_p2 = scmp.ne.s32.totalorder %s228_s18, %s845_s30 }
  0x22   : > { %s850_s15 = sshll.u32 %s1014_s28, 4  ;;  %s851_s15 = int_to_ptr.vmem [resolvable:$false] %s850_s15 }
  0x23   : > { %p848_p4 = pnand %p846_p2, %p834_p1  ;;  %s852_s16 = scalar_lea.vmem %s851_s15, 1024 }
  0x24   : > { %p853_p6 = scmp.lt.s32.totalorder %s228_s18, %s851_s15  ;;  %p854_p7 = scmp.lt.s32.totalorder %s852_s16, %s845_s30 }
  0x25   : > { %p849_p5 = pneg %p848_p4 }
  0x26   : > { %p855_p10 = por %p854_p7, %p853_p6 }
  0x28   : > { %p856_p11 = pnand %p855_p10, %p849_p5 }
  0x2a   : > { %859 = shalt.err (!%p856_p11)
}
  0x2b   : > { %s1015_s4 = smov 256   ;;  %s1016_s5 = smov 128  }
  0x2c   : > { %s1017_s29 = smov 8   ;;  %p665_p3 = scmp.ge.s32.totalorder %s1012_s25, 1 }
  0x2d   : > { %741 = dma.hbm_to_vmem [thread:$0]  (!%p1151_p0), %s226_s6, 512, %s228_s18, %s216_s11, %s1015_s4, %s1016_s5, %s1017_s29  }
  0x2e   : > { %p235_p13 = scmp.lt.s32.totalorder %s1012_s25, 5 }
  0x30   : > { %p236_p1 = pnand %p665_p3, %p235_p13 }
  0x31   : > { %s1162_s7 = sand.u32 (!%p236_p1), 1, %s988_s19  }
  0x32   : > { %239 = sbr.rel (%p236_p1) target bundleno = 421 (0x1a5), region = 32  ;;  %s666_s13 = sshll.u32 (!%p236_p1), %s1162_s7, 5 }
  0x33   : > { %s242_s17 = scalar_lea.sflag (!%p236_p1), [#allocation3], %s1162_s7  ;;  %s245_s30 = scalar_lea.vmem (!%p236_p1), [#allocation2], %s666_s13 }
  0x37   : > { %971 = dma.done.wait (%p1123_p8), %s242_s17, 512  }
  0x38   : > { %973 = vsyncadd (%p1123_p8), %s242_s17, 4294966784  ;;  %v1018_v0 = vmov 0.0   ;;  %vm1019_vm0 = vmmov 0   ;;  %v1020_v1 = vmov 0   ;;  %v830_v2 = vld [vmem:[%s1350_s1] sm:$0xff]   ;;  %v831_v3 = vld [vmem:[%s1350_s1 + $0x8] sm:$0xff]   ;;  %v423_v21 = vlaneseq }
  0x39   : > { %710 = vmatprep.subr.bf16.mxu0 %v1018_v0  ;;  %726 = vmatprep.subr.bf16.mxu1 %v1018_v0  ;;  %v285_v4 = vld [vmem:[%s245_s30 + $0x10] sm:$0xff]  ;;  %v286_v5 = vld [vmem:[%s245_s30 + $0x18] sm:$0xff]  ;;  %v283_v6 = vld [vmem:[%s245_s30] sm:$0xff]  ;;  %vm351_vm1 = vcmask 261120   ;;  %v1021_v19 = vmov 1983009808  }
  0x3a   : > { %714 = vmatprep.mubr.msk.bf16.mxu0 %vm1019_vm0, %v1018_v0  ;;  %718 = vmatprep.mubr.msk.bf16.mxu1 %vm1019_vm0, %v1018_v0  ;;  %v288_v7 = vpack.c.bf16 %v286_v5, %v285_v4  ;;  %v284_v8 = vld [vmem:[%s245_s30 + $0x8] sm:$0xff]  ;;  %v293_v9 = vld [vmem:[%s1351_s2] sm:$0xff]  ;;  %v296_v12 = vld [vmem:[%s1351_s2 + $0x18] sm:$0xff]  ;;  %v421_v20 = vunpack.c.l.s4 %v1021_v19  ;;  %s682_s18 = sshll.u32 %s1000_s22, 1  ;;  %s667_s6 = sshll.u32 %s1162_s7, 1  ;;  %v424_v23 = vshrl.u32 %v423_v21, 7 }
  0x3b   : > { %828 = vset.pattern.permute.xlu1 %v1020_v1  ;;  %335 = vxpose.xlu0.c.b16.start [1/2] (short) (narrow) %v830_v2, 48  ;;  %v287_v10 = vpack.c.bf16 %v284_v8, %v283_v6  ;;  %v294_v11 = vld [vmem:[%s1351_s2 + $0x8] sm:$0xff]  ;;  %v297_v13 = vld [vmem:[%s1351_s2 + $0x20] sm:$0xff]  ;;  %v295_v14 = vld [vmem:[%s1351_s2 + $0x10] sm:$0xff]  ;;  %s1197_s10 = sadd.s32 %s996_s21, %s682_s18  ;;  %s267_s8 = scalar_lea.vmem [#allocation5], %s667_s6 }
  0x3c   : > { %300 = vperm.xlu1 %828, %v293_v9   ;;  %711 = vmatpush3.bf16.msra.mxu0 %v288_v7  ;;  %v422_v22 = vunpack.c.0.s8 %v421_v20  ;;  %s683_s11 = sshll.u32 %s1197_s10, 5  ;;  %s476_s28 = sshll.u32 %s267_s8, 4  ;;  %s1209_s28 = int_to_ptr.vmem [resolvable:$true] %s476_s28 }
  0x3d   : > { %728 = vmatpush3.bf16.msra.mxu1 %v288_v7  ;;  %712 = vmatprep.subr.bf16.mxu0 %v1018_v0  ;;  %s1207_s29 = scalar_lea.hbm %s1352_s3, %s683_s11  ;;  %s1211_s13 = scalar_lea.vmem [#allocation6], %s667_s6 }
  0x3e   : > { %727 = vmatprep.subr.bf16.mxu1 %v1018_v0  ;;  %v425_v27 = vsub.s32 %v422_v22, %v424_v23  ;;  %s451_s18 = scalar_lea.sflag [#allocation4], %s1162_s7  ;;  %s860_s4 = scalar_lea.vmem %s1209_s28, 32 }
  0x3f   : > { %336 = vxpose.xlu0.c.b16.end [2/2] (short) (narrow) %v831_v3, 48  ;;  %p861_p8 = scmp.ne.s32.totalorder %s1209_s28, %s860_s4  ;;  %s1022_s6 = smov [#allocation5]  }
  0x40   : > { %305 = vperm.xlu1 %828, %v294_v11   ;;  %713 = vmatpush3.bf16.msra.mxu0 %v287_v10  ;;  %s864_s5 = sshll.u32 %s1022_s6, 4  ;;  %s865_s5 = int_to_ptr.vmem [resolvable:$false] %s864_s5 }
  0x41   : > { %729 = vmatpush3.bf16.msra.mxu1 %v287_v10  ;;  %p862_p0 = pnand %p861_p8, %p1127_p9  ;;  %s866_s27 = scalar_lea.vmem %s865_s5, 64 }
  0x42   : > { %p867_p4 = scmp.lt.s32.totalorder %s1209_s28, %s865_s5  ;;  %p868_p5 = scmp.lt.s32.totalorder %s866_s27, %s860_s4 }
  0x43   : > { %p863_p2 = pneg %p862_p0 }
  0x44   : > { %315 = vperm.xlu1 %828, %v296_v12   ;;  %p869_p6 = por %p868_p5, %p867_p4 }
  0x46   : > { %p870_p7 = pnand %p869_p6, %p863_p2 }
  0x48   : > { %829 = vset.pattern.permute.xlu0 %v1020_v1  ;;  %320 = vperm.xlu1 %828, %v297_v13  }
  0x4c   : > { %310 = vperm.xlu0 %829, %v295_v14  }
  0x9d   : > { %v343_v15 = vpop.trf.xlu0 }
  0x9e   : > { %715 = vmatmul.mubr.msk.bf16.vlgmr.msra.gmra.mxu0 %vm351_vm1, %v343_v15 }
  0xa1   : > { %v344_v16 = vpop.trf.xlu0 }
  0xa2   : > { %719 = vmatmul.mubr.msk.bf16.vlgmr.msra.gmra.mxu1 %vm351_vm1, %v344_v16 }
  0xa3   : > { %722 = vmatprep.mubr.msk.bf16.mxu1 %vm1019_vm0, %v1018_v0 }
  0xa5   : > { %v345_v17 = vpop.trf.xlu0 }
  0xaa   : > { %723 = vmatmul.mubr.msk.bf16.gmra.mxu1 %vm351_vm1, %v345_v17 }
  0xb7   : > { %v301_v18 = vpop.permute.xlu1 %300 }
  0xbb   : > { %v306_v24 = vpop.permute.xlu1 %305 }
  0xbf   : > { %v1214_v33 = vpop.permute.xlu1 %315 }
  0xc7   : > { %v311_v29 = vpop.permute.xlu0 %310 }
 0x15e   : > { %v395_v25 = vpop.f32.mrf.mxu0 }
 0x15f   : > { %v396_v26 = vadd.f32 %v395_v25, %v301_v18 }
 0x160   : > { %v716_v28 = vpop.f32.mrf.mxu0 }
 0x161   : > { %v417_v30 = vpack.c.bf16 %v396_v26, %v396_v26 }
 0x162   : > { %v398_v31 = vpop.f32.mrf.mxu0  ;;  %v403_v32 = vpop.f32.mrf.mxu1 }
 0x163   : > { %418 = vst [vmem:[%s267_s8] sm:$0x3] %v417_v30  ;;  %v426_v34 = vrot.slane %v417_v30, %v425_v27  ;;  %v399_v35 = vadd.f32 %v398_v31, %v306_v24  ;;  %v404_v36 = vadd.f32 %v403_v32, %v311_v29 }
 0x164   : > { %v717_v37 = vpop.f32.mrf.mxu0  ;;  %v720_v38 = vpop.f32.mrf.mxu1 }
 0x165   : > { %873 = shalt.err (!%p870_p7)
}
 0x166   : > { %s874_s8 = scalar_lea.hbm %s1207_s29, 32  ;;  %s878_s6 = scalar_lea.hbm %s1352_s3, 128 }
 0x167   : > { %p875_p10 = scmp.ne.s32.totalorder %s1207_s29, %s874_s8  ;;  %p879_p13 = scmp.lt.s32.totalorder %s1207_s29, %s1352_s3 }
 0x168   : > { %p880_p1 = scmp.lt.s32.totalorder %s878_s6, %s874_s8 }
 0x169   : > { %p876_p11 = pnand %p875_p10, %p1127_p9 }
 0x16a   : > { %p881_p8 = por %p880_p1, %p879_p13 }
 0x16b   : > { %p877_p3 = pneg %p876_p11 }
 0x16d   : > { %p882_p0 = pnand %p881_p8, %p877_p3 }
 0x16f   : > { %885 = shalt.err (!%p882_p0)
}
 0x170   : > { %732 = dma.vmem_to_hbm [thread:$0]  (%p1127_p9), %s1209_s28, 32, %s1207_s29, %s451_s18   ;;  %v427_v39 = vcombine.high %v426_v34, %v426_v34  ;;  %v697_v40 = vpack.c.bf16 %v404_v36, %v399_v35  ;;  %v406_v41 = vpop.f32.mrf.mxu1 }
 0x171   : > { %s1371_s16 = sld [smem:[#allocation15_spill]]  ;;  %s1372_s30 = sshll.u32 %s1211_s13, 4  ;;  %s1247_s30 = int_to_ptr.vmem [resolvable:$true] %s1372_s30 }
 0x172   : > { %s1373_s4 = sshll.u32 %s1000_s22, 3  ;;  %s1374_s8 = sshll.u32 %s1162_s7, 4  ;;  %429 = vst [vmem:[%s1211_s13] sm:$0x3] %v427_v39  ;;  %v721_v42 = vpop.f32.mrf.mxu1 }
 0x173   : > { %s1252_s5 = sadd.s32 %s996_s21, %s1373_s4  ;;  %s1256_s28 = scalar_lea.vmem [#allocation8], %s1374_s8 }
 0x174   : > { %698 = vst [vmem:[%s1256_s28] sm:$0xff] %v697_v40   ;;  %s505_s10 = sshll.u32 %s1256_s28, 4  ;;  %s886_s18 = scalar_lea.vmem %s1247_s30, 32  ;;  %s1289_s10 = int_to_ptr.vmem [resolvable:$true] %s505_s10 }
 0x175   : > { %p887_p2 = scmp.ne.s32.totalorder %s1247_s30, %s886_s18  ;;  %s1023_s22 = smov [#allocation6]  }
 0x176   : > { %s890_s21 = sshll.u32 %s1023_s22, 4  ;;  %s891_s21 = int_to_ptr.vmem [resolvable:$false] %s890_s21 }
 0x177   : > { %s1243_s17 = scalar_lea.hbm %s1371_s16, %s683_s11  ;;  %s1375_s11 = sand.u32 1, %s1099_s26  }
 0x178   : > { %s1263_s29 = scalar_lea.sflag [#allocation7], %s1375_s11  ;;  %p888_p4 = pnand %p887_p2, %p1127_p9 }
 0x179   : > { %s892_s7 = scalar_lea.vmem %s891_s21, 64  ;;  %p893_p6 = scmp.lt.s32.totalorder %s1247_s30, %s891_s21 }
 0x17a   : > { %p889_p5 = pneg %p888_p4  ;;  %p894_p7 = scmp.lt.s32.totalorder %s892_s7, %s886_s18 }
 0x17c   : > { %p895_p10 = por %p894_p7, %p893_p6 }
 0x17e   : > { %p896_p11 = pnand %p895_p10, %p889_p5 }
 0x180   : > { %899 = shalt.err (!%p896_p11)
}
 0x181   : > { %s900_s26 = scalar_lea.hbm %s1243_s17, 32  ;;  %s904_s27 = scalar_lea.hbm %s1371_s16, 128 }
 0x182   : > { %p901_p3 = scmp.ne.s32.totalorder %s1243_s17, %s900_s26  ;;  %p905_p8 = scmp.lt.s32.totalorder %s1243_s17, %s1371_s16 }
 0x183   : > { %p906_p0 = scmp.lt.s32.totalorder %s904_s27, %s900_s26 }
 0x184   : > { %p902_p13 = pnand %p901_p3, %p1127_p9 }
 0x185   : > { %p907_p2 = por %p906_p0, %p905_p8 }
 0x186   : > { %p903_p1 = pneg %p902_p13 }
 0x188   : > { %p908_p4 = pnand %p907_p2, %p903_p1 }
 0x18a   : > { %911 = shalt.err (!%p908_p4)
}
 0x18b   : > { %733 = dma.vmem_to_hbm [thread:$0]  (%p1127_p9), %s1247_s30, 32, %s1243_s17, %s1263_s29   ;;  %v321_v43 = vpop.permute.xlu1 %320  ;;  %v411_v44 = vpop.f32.mrf.mxu1  ;;  %v407_v45 = vadd.f32 %v406_v41, %v1214_v33 }
 0x18c   : > { %s687_s8 = sshll.u32 %s1252_s5, 6  ;;  %v412_v46 = vadd.f32 %v411_v44, %v321_v43  ;;  %s1376_s22 = sld [smem:[#allocation16_spill]] }
 0x18d   : > { %v724_v47 = vpop.f32.mrf.mxu1  ;;  %s912_s17 = scalar_lea.vmem %s1289_s10, 256  ;;  %s1024_s30 = smov [#allocation8]  }
 0x18e   : > { %v702_v48 = vpack.c.bf16 %v412_v46, %v407_v45  ;;  %p913_p5 = scmp.ne.s32.totalorder %s1289_s10, %s912_s17  ;;  %s916_s5 = sshll.u32 %s1024_s30, 4  ;;  %s917_s5 = int_to_ptr.vmem [resolvable:$false] %s916_s5 }
 0x18f   : > { %v414_v49 = vpop.f32.mrf.mxu1  ;;  %s918_s26 = scalar_lea.vmem %s917_s5, 512  ;;  %p919_p10 = scmp.lt.s32.totalorder %s1289_s10, %s917_s5 }
 0x190   : > { %704 = vst [vmem:[%s1256_s28 + $0x8] sm:$0xff] %v702_v48   ;;  %p914_p6 = pnand %p913_p5, %p1127_p9  ;;  %p920_p11 = scmp.lt.s32.totalorder %s918_s26, %s912_s17 }
 0x191   : > { %v725_v50 = vpop.f32.mrf.mxu1 }
 0x192   : > { %s1377_s7 = smov %s1376_s22  ;;  %s1295_s21 = scalar_lea.hbm %s1376_s22, %s687_s8 }
 0x193   : > { %p915_p7 = pneg %p914_p6  ;;  %p921_p3 = por %p920_p11, %p919_p10 }
 0x195   : > { %p922_p13 = pnand %p921_p3, %p915_p7 }
 0x197   : > { %925 = shalt.err (!%p922_p13)
}
 0x198   : > { %s926_s28 = scalar_lea.hbm %s1295_s21, 256  ;;  %s930_s27 = scalar_lea.hbm %s1377_s7, 1024 }
 0x199   : > { %p927_p1 = scmp.ne.s32.totalorder %s1295_s21, %s926_s28  ;;  %p931_p2 = scmp.lt.s32.totalorder %s1295_s21, %s1377_s7 }
 0x19a   : > { %p932_p4 = scmp.lt.s32.totalorder %s930_s27, %s926_s28 }
 0x19b   : > { %p928_p8 = pnand %p927_p1, %p1127_p9 }
 0x19c   : > { %p933_p5 = por %p932_p4, %p931_p2 }
 0x19d   : > { %p929_p0 = pneg %p928_p8 }
 0x19f   : > { %p934_p6 = pnand %p933_p5, %p929_p0 }
 0x1a1   : > { %937 = shalt.err (!%p934_p6)
}
 0x1a2   : > { %s1025_s8 = smov 64   ;;  %s1026_s11 = smov 128  }
 0x1a3   : > { %s1027_s18 = smov 4  }
 0x1a4   : > { %734 = dma.vmem_to_hbm [thread:$0]  (%p1127_p9), %s1289_s10, 256, %s1295_s21, %s1263_s29, %s1025_s8, %s1026_s11, %s1027_s18  }
 0x1a5 PF: > { %s1378_s22 = sld [smem:[#allocation12_spill]]  ;;  %p753_p7 = scmp.ge.s32.totalorder %s1012_s25, 2 }
 0x1a7   : > { %p743_p10 = pnand %p753_p7, %p1135_p12 }
 0x1a9   : > { %p744_p11 = pneg %p743_p10 }
 0x1ab   : > { %s520_s17 = sand.u32 1, %s1378_s22  }
 0x1ac   : > { %s521_s30 = scalar_lea.sflag [#allocation4], %s520_s17 }
 0x1ad   : > { %975 = dma.done.wait (%p744_p11), %s521_s30, 32  }
 0x1ae   : > { %977 = vsyncadd (%p744_p11), %s521_s30, 4294967264  ;;  %s1379_s5 = sadd.s32 4294967294, %s1012_s25  }
 0x1af   : > { %s529_s26 = sand.u32 1, %s1379_s5  }
 0x1b0   : > { %s530_s28 = scalar_lea.sflag [#allocation7], %s529_s26 }
 0x1b1   : > { %979 = dma.done.wait (%p744_p11), %s530_s28, 288  }
 0x1b2   : > { %981 = vsyncadd (%p744_p11), %s530_s28, 4294967008  ;;  %s25_s25 = sadd.s32 1, %s1012_s25   ;;  %s1380_s9 = sld [smem:[#allocation13_spill]] }
 0x1b3   : > { %p22_p9 = scmp.ge.s32.totalorder %s25_s25, 6   ;;  %s1381_s12 = sld [smem:[#allocation14_spill]] }
 0x1b4   : > { %s1382_s18 = smov %s988_s19  ;;  %s1383_s19 = smov %s992_s20 }
 0x1b5   : > { %s1384_s20 = smov %s1142_s14  ;;  %s1385_s21 = smov %s1004_s23 }
 0x1b6   : > { %s1386_s22 = smov %s1008_s24  ;;  %24 = sbr.rel (!%p22_p9) target bundleno = 12 (0xc), region = 109 }
 0x1b8   : > { %s1387_s23 = smov %s1380_s9 }
 0x1b9   : > { %s1388_s24 = smov %s1381_s12 }
 0x1bb   :  { %544 = vsyncpa [#allocation3], 1 }
 0x1bc   :  { %546 = vsyncpa [#allocation3 + $0x1], 1 }
 0x1bd   :  { %547 = vsyncpa [#allocation4], 1 }
 0x1be   :  { %549 = vsyncpa [#allocation4 + $0x1], 1 }
 0x1bf   :  { %550 = vsyncpa [#allocation7], 1 }
 0x1c0   :  { %552 = vsyncpa [#allocation7 + $0x1], 1 }

</bundles_post_ra>
